<compile_context>
chip_gen: v5e
topology: v5e:2x2
jax: 0.10.0
libtpu: 0.0.40
codegen_flags: <defaults>
</compile_context>

<pallas_src>
import functools

import jax
import jax.numpy as jnp
from jax.experimental import pallas as pl
from jax.experimental.pallas import tpu as pltpu


def _gumbel_select_kernel(x_ref, logits_ref, u_ref, o_ref, w_ref, *,
                          inv_tau, hard, mxu_dtype):
    """One batch tile: o = x_tile @ weights, weights cached in VMEM scratch."""
    eps = 1e-20

    # Compute the (in_features, out_features) weights once, on the first batch
    # tile; later tiles reuse the VMEM scratch (grid axis is "arbitrary").
    @pl.when(pl.program_id(0) == 0)
    def _compute_weights():
        u = u_ref[...]
        gumbel = -jnp.log(-jnp.log(u + eps) + eps)
        y = logits_ref[...] + gumbel
        if hard:
            # argmax(softmax(y / tau), dim=0) == argmax(y, dim=0) for tau > 0,
            # so the hard path builds the one-hot directly: no exp / sum / div.
            idx = jnp.argmax(y, axis=0)                              # (f_out,)
            rows = jax.lax.broadcasted_iota(jnp.int32, y.shape, 0)
            w = jnp.where(rows == idx[None, :], 1.0, 0.0)
        else:
            y = y * inv_tau                       # hoisted 1/tau: mul, not div
            y = y - jnp.max(y, axis=0, keepdims=True)
            e = jnp.exp(y)
            # EUP approximate reciprocal instead of a VPU divide.
            inv_sum = pl.reciprocal(jnp.sum(e, axis=0, keepdims=True),
                                    approx=True)
            w = e * inv_sum
        w_ref[...] = w.astype(w_ref.dtype)

    o_ref[...] = jnp.dot(
        x_ref[...].astype(mxu_dtype), w_ref[...],
        preferred_element_type=jnp.float32,
    ).astype(o_ref.dtype)


def _pick_batch_tile(batch):
    if batch <= 512:
        return batch
    for tb in (512, 256, 128, 64, 8):
        if batch % tb == 0:
            return tb
    return batch  # fallback: single block


def gumbel_feature_selector(x, logits, u, *, tau=1.0, hard=False,
                            mxu_dtype=None, batch_tile=None):
    """Forward pass of GumbelFeatureSelector.

    x:      (B, in_features)
    logits: (in_features, out_features)  -- module parameter
    u:      (in_features, out_features)  -- uniform(0,1) samples (gumbel noise)
    mxu_dtype: dtype fed to the MXU (jnp.bfloat16 is the throughput path on
               v6e/v7x; defaults to x.dtype for exactness).
    """
    assert tau > 0.0, "tau must be > 0 (matches PyTorch numerics otherwise)"
    B, f_in = x.shape
    f_in2, f_out = logits.shape
    assert f_in == f_in2 and u.shape == logits.shape

    if mxu_dtype is None:
        mxu_dtype = x.dtype
    tb = batch_tile if batch_tile is not None else _pick_batch_tile(B)
    assert B % tb == 0, "batch must be divisible by the batch tile"
    n_tiles = B // tb

    kernel = functools.partial(
        _gumbel_select_kernel,
        inv_tau=float(1.0 / tau), hard=hard, mxu_dtype=mxu_dtype)

    return pl.pallas_call(
        kernel,
        out_shape=jax.ShapeDtypeStruct((B, f_out), x.dtype),
        grid=(n_tiles,),
        in_specs=[
            pl.BlockSpec((tb, f_in), lambda i: (i, 0)),      # batch tile of x
            pl.BlockSpec((f_in, f_out), lambda i: (0, 0)),   # resident logits
            pl.BlockSpec((f_in, f_out), lambda i: (0, 0)),   # resident noise
        ],
        out_specs=pl.BlockSpec((tb, f_out), lambda i: (i, 0)),
        scratch_shapes=[pltpu.VMEM((f_in, f_out), mxu_dtype)],  # cached weights
        # "arbitrary": the weights scratch is filled only at program_id(0)==0
        # and reused by later tiles, so the batch axis must run sequentially
        # on one TensorCore.  For v7x dual-TC, shard the batch at the XLA
        # level (shard_map/vmap) or recompute weights per tile and mark this
        # axis "parallel".
        compiler_params=pltpu.CompilerParams(
            dimension_semantics=("arbitrary",)),
    )(x, logits, u)


def _reference(x, logits, u, tau=1.0, hard=False):
    eps = 1e-20
    gumbel = -jnp.log(-jnp.log(u + eps) + eps)
    w = jax.nn.softmax((logits + gumbel) / tau, axis=0)
    if hard:
        idx = jnp.argmax(w, axis=0)
        w = jax.nn.one_hot(idx, w.shape[0], axis=0, dtype=w.dtype)
    return x @ w


if __name__ == "__main__":
    key = jax.random.PRNGKey(0)
    tau = 1.0

    # --- Case 1: module-scale shapes (in=32, out=16, batch=8), f32 MXU. -----
    in_f, out_f, batch = 32, 16, 8
    k1, k2, k3, key = jax.random.split(key, 4)
    logits = jax.random.normal(k1, (in_f, out_f), jnp.float32)
    x = jax.random.normal(k2, (batch, in_f), jnp.float32)
    u = jax.random.uniform(k3, (in_f, out_f), jnp.float32)

    out_soft = gumbel_feature_selector(x, logits, u, tau=tau, hard=False)
    out_hard = gumbel_feature_selector(x, logits, u, tau=tau, hard=True)
    jax.block_until_ready((out_soft, out_hard))

    ref_soft = _reference(x, logits, u, tau=tau, hard=False)
    ref_hard = _reference(x, logits, u, tau=tau, hard=True)
    assert out_soft.shape == (batch, out_f)
    # soft path uses the EUP approximate reciprocal -> slightly looser tol
    assert jnp.allclose(out_soft, ref_soft, atol=2e-2, rtol=2e-2)
    # hard path is an exact one-hot column select
    assert jnp.allclose(out_hard, ref_hard, atol=1e-5, rtol=1e-5)

    # --- Case 2: batch grid (4 tiles), lane-dense 128-wide output, bf16 MXU. -
    in_f, out_f, batch = 256, 128, 1024
    k1, k2, k3, key = jax.random.split(key, 4)
    logits = jax.random.normal(k1, (in_f, out_f), jnp.float32)
    x = jax.random.normal(k2, (batch, in_f), jnp.float32)
    u = jax.random.uniform(k3, (in_f, out_f), jnp.float32)

    out_soft = gumbel_feature_selector(x, logits, u, tau=tau, hard=False,
                                       batch_tile=256)
    out_hard = gumbel_feature_selector(x, logits, u, tau=tau, hard=True,
                                       batch_tile=256)
    out_bf16 = gumbel_feature_selector(x, logits, u, tau=tau, hard=False,
                                       batch_tile=256, mxu_dtype=jnp.bfloat16)
    jax.block_until_ready((out_soft, out_hard, out_bf16))

    ref_soft = _reference(x, logits, u, tau=tau, hard=False)
    ref_hard = _reference(x, logits, u, tau=tau, hard=True)
    assert jnp.allclose(out_soft, ref_soft, atol=2e-2, rtol=2e-2)
    assert jnp.allclose(out_hard, ref_hard, atol=1e-4, rtol=1e-4)
    # bf16 MXU operands: standard precision trade, just sanity-bound the error.
    assert float(jnp.max(jnp.abs(out_bf16 - ref_soft))) < 0.15

    print("KERNEL_OK")
</pallas_src>

<mosaic_0001>
module attributes {stable_mosaic.version = 11 : i64} {
  func.func @_gumbel_select_kernel(%arg0: i32, %arg1: memref<8x32xf32, #tpu.memory_space<vmem>>, %arg2: memref<32x16xf32, #tpu.memory_space<vmem>>, %arg3: memref<32x16xf32, #tpu.memory_space<vmem>>, %arg4: memref<8x16xf32, #tpu.memory_space<vmem>>, %arg5: memref<32x16xf32, #tpu.memory_space<vmem>>) attributes {dimension_semantics = [#tpu.dimension_semantics<arbitrary>], iteration_bounds = array<i64: 1>, scalar_prefetch = 0 : i64, scratch_operands = 1 : i64, tpu.core_type = #tpu.core_type<tc>, window_params = [{transform_indices = @transform_0, window_bounds = array<i64: 8, 32>}, {pipeline_mode = #tpu.pipeline_mode<synchronous>, transform_indices = @transform_1, window_bounds = array<i64: 32, 16>}, {pipeline_mode = #tpu.pipeline_mode<synchronous>, transform_indices = @transform_2, window_bounds = array<i64: 32, 16>}, {transform_indices = @transform_3, window_bounds = array<i64: 8, 16>}]} {
    %c0_i32 = arith.constant 0 : i32
    %0 = arith.cmpi eq, %arg0, %c0_i32 : i32
    %1 = arith.extui %0 : i1 to i32
    %c0_i32_0 = arith.constant 0 : i32
    %2 = arith.cmpi ne, %1, %c0_i32_0 : i32
    scf.if %2 {
      %c0_6 = arith.constant 0 : index
      %c0_7 = arith.constant 0 : index
      %7 = vector.load %arg3[%c0_6, %c0_7] : memref<32x16xf32, #tpu.memory_space<vmem>>, vector<32x16xf32>
      %cst_8 = arith.constant 9.99999968E-21 : f32
      %8 = vector.broadcast %cst_8 : f32 to vector<32x16xf32>
      %9 = arith.addf %7, %8 : vector<32x16xf32>
      %10 = math.log %9 : vector<32x16xf32>
      %cst_9 = arith.constant 0.000000e+00 : f32
      %11 = vector.broadcast %cst_9 : f32 to vector<32x16xf32>
      %12 = arith.subf %11, %10 : vector<32x16xf32>
      %cst_10 = arith.constant 9.99999968E-21 : f32
      %13 = vector.broadcast %cst_10 : f32 to vector<32x16xf32>
      %14 = arith.addf %12, %13 : vector<32x16xf32>
      %15 = math.log %14 : vector<32x16xf32>
      %cst_11 = arith.constant 0.000000e+00 : f32
      %16 = vector.broadcast %cst_11 : f32 to vector<32x16xf32>
      %17 = arith.subf %16, %15 : vector<32x16xf32>
      %c0_12 = arith.constant 0 : index
      %c0_13 = arith.constant 0 : index
      %18 = vector.load %arg2[%c0_12, %c0_13] : memref<32x16xf32, #tpu.memory_space<vmem>>, vector<32x16xf32>
      %19 = arith.addf %18, %17 : vector<32x16xf32>
      %cst_14 = arith.constant 1.000000e+00 : f32
      %20 = vector.broadcast %cst_14 : f32 to vector<32x16xf32>
      %21 = arith.mulf %19, %20 : vector<32x16xf32>
      %cst_15 = arith.constant dense<0xFF800000> : vector<16xf32>
      %22 = vector.multi_reduction <maximumf>, %21, %cst_15 [0] : vector<32x16xf32> to vector<16xf32>
      %23 = vector.shape_cast %22 : vector<16xf32> to vector<1x16xf32>
      %24 = vector.broadcast %23 : vector<1x16xf32> to vector<32x16xf32>
      %25 = arith.subf %21, %24 : vector<32x16xf32>
      %26 = math.exp %25 : vector<32x16xf32>
      %cst_16 = arith.constant dense<0.000000e+00> : vector<16xf32>
      %27 = vector.multi_reduction <add>, %26, %cst_16 [0] : vector<32x16xf32> to vector<16xf32>
      %28 = vector.shape_cast %27 : vector<16xf32> to vector<1x16xf32>
      %29 = tpu.reciprocal %28 {approx = true} : vector<1x16xf32> -> vector<1x16xf32>
      %30 = vector.broadcast %29 : vector<1x16xf32> to vector<32x16xf32>
      %31 = arith.mulf %26, %30 : vector<32x16xf32>
      %c0_17 = arith.constant 0 : index
      %c0_18 = arith.constant 0 : index
      %32 = vector.load %arg5[%c0_17, %c0_18] : memref<32x16xf32, #tpu.memory_space<vmem>>, vector<32x16xf32>
      tpu.vector_store %arg5[%c0_17, %c0_18], %31 {strides = array<i32>} : memref<32x16xf32, #tpu.memory_space<vmem>>, vector<32x16xf32>,
    } else {
    }
    %c0 = arith.constant 0 : index
    %c0_1 = arith.constant 0 : index
    %3 = vector.load %arg1[%c0, %c0_1] : memref<8x32xf32, #tpu.memory_space<vmem>>, vector<8x32xf32>
    %c0_2 = arith.constant 0 : index
    %c0_3 = arith.constant 0 : index
    %4 = vector.load %arg5[%c0_2, %c0_3] : memref<32x16xf32, #tpu.memory_space<vmem>>, vector<32x16xf32>
    %cst = arith.constant dense<0.000000e+00> : vector<8x16xf32>
    %5 = tpu.matmul %3, %4, %cst {dimension_numbers = #tpu.dot_dimension_numbers<[1], [0], [0], [1], [0, 0, 1, 1], [], []>} : vector<8x32xf32>, vector<32x16xf32>, vector<8x16xf32> -> vector<8x16xf32>
    %c0_4 = arith.constant 0 : index
    %c0_5 = arith.constant 0 : index
    %6 = vector.load %arg4[%c0_4, %c0_5] : memref<8x16xf32, #tpu.memory_space<vmem>>, vector<8x16xf32>
    tpu.vector_store %arg4[%c0_4, %c0_5], %5 {strides = array<i32>} : memref<8x16xf32, #tpu.memory_space<vmem>>, vector<8x16xf32>,
    return
  }
  func.func @transform_0(%arg0: i32) -> (i32, i32) {
    %c0_i32 = arith.constant 0 : i32
    %c0_i32_0 = arith.constant 0 : i32
    return %arg0, %c0_i32 : i32, i32
  }
  func.func @transform_1(%arg0: i32) -> (i32, i32) {
    %c0_i32 = arith.constant 0 : i32
    %c0_i32_0 = arith.constant 0 : i32
    %c0_i32_1 = arith.constant 0 : i32
    return %c0_i32, %c0_i32_0 : i32, i32
  }
  func.func @transform_2(%arg0: i32) -> (i32, i32) {
    %c0_i32 = arith.constant 0 : i32
    %c0_i32_0 = arith.constant 0 : i32
    %c0_i32_1 = arith.constant 0 : i32
    return %c0_i32, %c0_i32_0 : i32, i32
  }
  func.func @transform_3(%arg0: i32) -> (i32, i32) {
    %c0_i32 = arith.constant 0 : i32
    %c0_i32_0 = arith.constant 0 : i32
    return %arg0, %c0_i32 : i32, i32
  }
}

</mosaic_0001>

<bundles_post_ra>
// kernel: tpu_custom_call.1
= control target key start
LH: loop header
LB: loop body
LE: loop exit
PB: predicated region body
PF: predicated region fallthrough
CT: control target
= control target key end

     0   :  { %s276_s0 = inlined_call_operand.vmem [shape: f32[8,32], index: 0, kind: input, shape index: {}]   ;;  %s277_s1 = inlined_call_operand.vmem [shape: f32[32,16], index: 1, kind: input, shape index: {}]   ;;  %s278_s2 = inlined_call_operand.vmem [shape: f32[32,16], index: 2, kind: input, shape index: {}]   ;;  %s279_s3 = inlined_call_operand.hbm [shape: f32[8,16], index: 3, kind: output, shape index: {}]  }
   0x1   :  { %v19_v0 = vld [vmem:[%s278_s2] sm:$0xff]  ;;  %v20_v1 = vld [vmem:[%s278_s2 + $0x8] sm:$0xff]  ;;  %v21_v2 = vld [vmem:[%s278_s2 + $0x10] sm:$0xff] }
   0x2   :  { %v22_v3 = vld [vmem:[%s278_s2 + $0x18] sm:$0xff]  ;;  %v23_v4 = vadd.f32 1e-20, %v19_v0  ;;  %v24_v5 = vadd.f32 1e-20, %v20_v1 }
   0x3   :  { %v25_v6 = vadd.f32 1e-20, %v21_v2  ;;  %v26_v7 = vadd.f32 1e-20, %v22_v3 }
   0x4   :  { %160 = vlog2.f32 %v23_v4 }
   0x5   :  { %8 = vsyncpa [#allocation4], 0  ;;  %162 = vlog2.f32 %v24_v5  ;;  %v55_v29 = vld [vmem:[%s277_s1] sm:$0xff]  ;;  %v56_v33 = vld [vmem:[%s277_s1 + $0x8] sm:$0xff]  ;;  %vm63_vm0 = vcmask 130048   ;;  %vm116_vm1 = vcmask 261120  }
   0x6   :  { %164 = vlog2.f32 %v25_v6  ;;  %v57_v36 = vld [vmem:[%s277_s1 + $0x10] sm:$0xff]  ;;  %v58_v38 = vld [vmem:[%s277_s1 + $0x18] sm:$0xff]  ;;  %s212_s28 = smov [#allocation3]   ;;  %s149_s5 = sshll.u32 %s279_s3, 4  ;;  %s150_s5 = int_to_ptr.hbm [resolvable:$true] %s149_s5 }
   0x7   :  { %166 = vlog2.f32 %v26_v7  ;;  %s147_s29 = sshll.u32 %s212_s28, 4  ;;  %s148_s29 = int_to_ptr.vmem [resolvable:$true] %s147_s29 }
   0xa   :  { %v161_v8 = vpop.eup %160 }
   0xb   :  { %v163_v9 = vpop.eup %162  ;;  %v28_v10 = vmul.f32 0.6931472, %v161_v8 }
   0xc   :  { %v165_v11 = vpop.eup %164  ;;  %v30_v12 = vmul.f32 0.6931472, %v163_v9 }
   0xd   :  { %v167_v13 = vpop.eup %166  ;;  %v32_v14 = vmul.f32 0.6931472, %v165_v11  ;;  %v35_v15 = vsub.f32 0.0, %v28_v10 }
   0xe   :  { %v34_v16 = vmul.f32 0.6931472, %v167_v13  ;;  %v36_v17 = vsub.f32 0.0, %v30_v12 }
   0xf   :  { %v37_v18 = vsub.f32 0.0, %v32_v14  ;;  %v39_v19 = vadd.f32 1e-20, %v35_v15 }
  0x10   :  { %v38_v20 = vsub.f32 0.0, %v34_v16  ;;  %v40_v21 = vadd.f32 1e-20, %v36_v17 }
  0x11   :  { %v41_v22 = vadd.f32 1e-20, %v37_v18  ;;  %168 = vlog2.f32 %v39_v19 }
  0x12   :  { %v42_v23 = vadd.f32 1e-20, %v38_v20  ;;  %170 = vlog2.f32 %v40_v21 }
  0x13   :  { %172 = vlog2.f32 %v41_v22 }
  0x14   :  { %174 = vlog2.f32 %v42_v23 }
  0x17   :  { %v169_v24 = vpop.eup %168 }
  0x18   :  { %v171_v25 = vpop.eup %170  ;;  %v44_v26 = vmul.f32 0.6931472, %v169_v24 }
  0x19   :  { %v173_v27 = vpop.eup %172  ;;  %v46_v28 = vmul.f32 0.6931472, %v171_v25 }
  0x1a   :  { %v175_v30 = vpop.eup %174  ;;  %v48_v31 = vmul.f32 0.6931472, %v173_v27  ;;  %v51_v32 = vsub.f32 0.0, %v44_v26  ;;  %v111_v27 = vld [vmem:[%s276_s0] sm:$0xff] }
  0x1b   :  { %v50_v34 = vmul.f32 0.6931472, %v175_v30  ;;  %v52_v35 = vsub.f32 0.0, %v46_v28 }
  0x1c   :  { %v53_v37 = vsub.f32 0.0, %v48_v31  ;;  %v59_v39 = vadd.f32 %v55_v29, %v51_v32 }
  0x1d   :  { %v54_v40 = vsub.f32 0.0, %v50_v34  ;;  %v60_v41 = vadd.f32 %v56_v33, %v52_v35 }
  0x1e   :  { %v61_v42 = vadd.f32 %v57_v36, %v53_v37  ;;  %v64_v43 = vsel %vm63_vm0, %v59_v39, -inf }
  0x1f   :  { %v62_v44 = vadd.f32 %v58_v38, %v54_v40  ;;  %v65_v45 = vsel %vm63_vm0, %v60_v41, -inf }
  0x20   :  { %v66_v46 = vsel %vm63_vm0, %v61_v42, -inf  ;;  %v68_v47 = vmax.f32 %v64_v43, %v65_v45 }
  0x21   :  { %v67_v48 = vsel %vm63_vm0, %v62_v44, -inf }
  0x22   :  { %v69_v49 = vmax.f32 %v66_v46, %v67_v48 }
  0x24   :  { %v70_v50 = vmax.f32 %v68_v47, %v69_v49 }
  0x26   :  { %v71_v51 = vrot.slane %v70_v50, 4 }
  0x28   :  { %v72_v52 = vmax.f32 %v70_v50, %v71_v51 }
  0x2a   :  { %v73_v53 = vrot.slane %v72_v52, 2 }
  0x2c   :  { %v74_v54 = vmax.f32 %v72_v52, %v73_v53 }
  0x2e   :  { %v75_v55 = vrot.slane %v74_v54, 1 }
  0x30   :  { %v76_v56 = vmax.f32 %v74_v54, %v75_v55 }
  0x32   :  { %v77_v57 = vsub.f32 %v59_v39, %v76_v56  ;;  %v78_v58 = vsub.f32 %v60_v41, %v76_v56  ;;  %v79_v59 = vsub.f32 %v61_v42, %v76_v56  ;;  %v80_v60 = vsub.f32 %v62_v44, %v76_v56 }
  0x34   :  { %v81_v61 = vmul.f32 1.442695, %v77_v57  ;;  %v83_v62 = vmul.f32 1.442695, %v78_v58  ;;  %v85_v63 = vmul.f32 1.442695, %v79_v59 }
  0x35   :  { %v87_v0 = vmul.f32 1.442695, %v80_v60 }
  0x36   :  { %176 = vpow2.f32 %v81_v61 }
  0x37   :  { %178 = vpow2.f32 %v83_v62 }
  0x38   :  { %180 = vpow2.f32 %v85_v63 }
  0x39   :  { %182 = vpow2.f32 %v87_v0 }
  0x3c   :  { %v177_v1 = vpop.eup %176 }
  0x3d   :  { %v179_v2 = vpop.eup %178  ;;  %v89_v3 = vsel %vm63_vm0, %v177_v1, 0.0 }
  0x3e   :  { %v181_v4 = vpop.eup %180  ;;  %v90_v5 = vsel %vm63_vm0, %v179_v2, 0.0 }
  0x3f   :  { %v183_v6 = vpop.eup %182  ;;  %v91_v7 = vadd.f32 %v90_v5, %v89_v3  ;;  %v92_v8 = vsel %vm63_vm0, %v181_v4, 0.0 }
  0x40   :  { %v94_v9 = vsel %vm63_vm0, %v183_v6, 0.0 }
  0x41   :  { %v93_v10 = vadd.f32 %v92_v8, %v91_v7 }
  0x43   :  { %v95_v11 = vadd.f32 %v94_v9, %v93_v10 }
  0x45   :  { %v96_v12 = vrot.slane %v95_v11, 4 }
  0x47   :  { %v97_v13 = vadd.f32 %v96_v12, %v95_v11 }
  0x49   :  { %v98_v14 = vrot.slane %v97_v13, 2 }
  0x4b   :  { %v99_v15 = vadd.f32 %v98_v14, %v97_v13 }
  0x4d   :  { %v100_v16 = vrot.slane %v99_v15, 1 }
  0x4f   :  { %v101_v17 = vadd.f32 %v100_v16, %v99_v15 }
  0x51   :  { %184 = vrcp.f32 %v101_v17 }
  0x57   :  { %v185_v18 = vpop.eup %184 }
  0x58   :  { %v106_v19 = vmul.f32 %v185_v18, %v183_v6  ;;  %v105_v20 = vmul.f32 %v185_v18, %v181_v4  ;;  %v104_v21 = vmul.f32 %v185_v18, %v179_v2  ;;  %v103_v22 = vmul.f32 %v185_v18, %v177_v1 }
  0x5a   :  { %110 = vst.msk [vmem:[#allocation2 + $0x18] sm:$0xff] %vm63_vm0, %v106_v19 }
  0x5b   :  { %109 = vst.msk [vmem:[#allocation2 + $0x10] sm:$0xff] %vm63_vm0, %v105_v20 }
  0x5c   :  { %108 = vst.msk [vmem:[#allocation2 + $0x8] sm:$0xff] %vm63_vm0, %v104_v21 }
  0x5d   :  { %107 = vst.msk [vmem:[#allocation2] sm:$0xff] %vm63_vm0, %v103_v22 }
  0x61   :  { %v115_v23 = vld [vmem:[#allocation2 + $0x18] sm:$0xff] }
  0x62   :  { %132 = vmatpush.msra.mxu0 %v115_v23  ;;  %v114_v24 = vld [vmem:[#allocation2 + $0x10] sm:$0xff] }
  0x63   :  { %v113_v25 = vld [vmem:[#allocation2 + $0x8] sm:$0xff] }
  0x64   :  { %133 = vmatpush.msra.mxu0 %v114_v24  ;;  %v112_v26 = vld [vmem:[#allocation2] sm:$0xff] }
  0x66   :  { %134 = vmatpush.msra.mxu0 %v113_v25 }
  0x68   :  { %135 = vmatpush.msra.mxu0 %v112_v26 }
  0x69   :  { %158 = vmatmul.msk.f32.vlgmr.msra.gmra.mxu0 %vm116_vm1, %v111_v27 }
  0xe6   :  { %v137_v28 = vpop.f32.mrf.mxu0 }
  0xe7   :  { %141 = vst.msk [vmem:[#allocation3] sm:$0xff] %vm63_vm0, %v137_v28 }
  0xe8   :  { %152 = dma.vmem_to_hbm [thread:$0]  %s148_s29, 128, %s150_s5, [#allocation4]  }
  0xe9   :  { %210 = dma.done.wait [#allocation4], 128  }
  0xea   :  { %211 = vsyncadd [#allocation4], 4294967168 }
  0xeb   :  { %157 = vsyncpa [#allocation4], 1 }

</bundles_post_ra>
